<compile_context>
chip_gen: v5e
topology: v5e:2x2
jax: 0.10.0
libtpu: 0.0.40
codegen_flags: <defaults>
</compile_context>

<pallas_src>
import math

import jax
import jax.numpy as jnp
from jax import lax
from jax.experimental import pallas as pl
from jax.experimental.pallas import tpu as pltpu


def _rope_kernel(q_ref, k_ref, cos_ref, sin_ref, qo_ref, ko_ref):
    """Interleaved RoPE on lane-dense [R, L] slabs.

    cos_ref / sin_ref: per-element tables [R, L] in the activation dtype.
    sin has the even-position (-1) sign folded in, so
        out = x * cos + pair_swap(x) * sin.
    """
    c = cos_ref[...].astype(jnp.float32)                 # [R, L]
    s = sin_ref[...].astype(jnp.float32)
    R, L = c.shape
    lane = lax.broadcasted_iota(jnp.int32, (R, L), 1)
    is_even = (lane & 1) == 0

    def rotate(x):
        # Pair swap on the native (packed) dtype -- roll is a pure permutation;
        # upcast to f32 only for the FMA.
        swapped = jnp.where(
            is_even,
            pltpu.roll(x, L - 1, axis=1),                # x[l+1] lands at lane l
            pltpu.roll(x, 1, axis=1),                    # x[l-1] lands at lane l
        )
        return x.astype(jnp.float32) * c + swapped.astype(jnp.float32) * s

    if len(q_ref.shape) == 3:                            # (1, R, L) seq-tiled blocks
        qo_ref[0] = rotate(q_ref[0]).astype(qo_ref.dtype)
        ko_ref[0] = rotate(k_ref[0]).astype(ko_ref.dtype)
    else:                                                # (R, L) row-grouped blocks
        qo_ref[...] = rotate(q_ref[...]).astype(qo_ref.dtype)
        ko_ref[...] = rotate(k_ref[...]).astype(ko_ref.dtype)


def _round_up(x, m):
    return ((x + m - 1) // m) * m


def _tpu_block_defaults():
    """(block_target_bytes, vmem_limit_bytes) chosen per TPU generation."""
    vmem_cap = None
    try:
        vmem_cap = getattr(pltpu.get_tpu_info(), "vmem_capacity_bytes", None)
    except Exception:
        vmem_cap = None
    if vmem_cap is not None and vmem_cap >= 100 * 1024 * 1024:
        return 4 << 20, 64 << 20       # v5e / v6e: 128 MiB physical VMEM
    return 2 << 20, 32 << 20           # v7x / unknown: 64 MiB physical VMEM


class RotaryEmbeddingPallas:
    """JAX/Pallas port of RotaryEmbedding.forward (BHSD, dim == head_dim // 2, H == 1)."""

    def __init__(self, dim, base=10000, max_position_embeddings=32768,
                 interpolation_factor=None, block_target_bytes=None,
                 vmem_limit_bytes=None):
        self.dim = dim
        self.base = base
        self.max_position_embeddings = max_position_embeddings
        self.interpolation_factor = interpolation_factor
        bt, vl = _tpu_block_defaults()
        self.block_target_bytes = bt if block_target_bytes is None else block_target_bytes
        self.vmem_limit_bytes = vl if vmem_limit_bytes is None else vmem_limit_bytes
        # deterministic buffer, identical to the torch __init__
        self.inv_freq = 1.0 / (base ** (jnp.arange(0, dim, 2, dtype=jnp.float32) / dim))
        self._table_cache = {}
        self._table_cache_max = 8

    # ---------------- table construction (host-side, cached) ----------------

    def _freqs(self, S):
        needs_interp = (
            self.interpolation_factor is not None
            and S > self.max_position_embeddings // self.interpolation_factor)
        if not needs_interp:
            t = jnp.arange(S, dtype=jnp.float32)
            return t[:, None] * self.inv_freq[None, :]
        # Vectorized mirror of the reference per-position interpolation loop.
        # freqs_short[j] = j * inv_freq is linear in j, so the lerp collapses to a
        # position remap (with the reference's end clamp).
        # TODO(synk): the reference builds interpolated tables once at the largest
        # seen seq_len and slices for shorter calls; here they are rebuilt per S.
        base_seq_len = self.max_position_embeddings // self.interpolation_factor
        n_short = int(math.ceil(base_seq_len))           # len(torch.arange(base_seq_len))
        t_full = jnp.arange(S, dtype=jnp.float32) * (base_seq_len / S)
        idx_low = jnp.floor(t_full).astype(jnp.int32)
        idx_high = jnp.minimum(idx_low + 1, n_short - 1)
        w_high = t_full - idx_low.astype(jnp.float32)
        t_eff = jnp.where(idx_low == idx_high,
                          idx_low.astype(jnp.float32),
                          (1.0 - w_high) * idx_low + w_high * idx_high)
        return t_eff[:, None] * self.inv_freq[None, :]

    def _tables(self, S, D, L, tile, table_dtype):
        """Per-element cos/sin tables folded to [(S*D//L) * tile, L] in table_dtype."""
        key = (S, D, L, tile, jnp.dtype(table_dtype).name)
        hit = self._table_cache.get(key)
        if hit is not None:
            return hit
        freqs = self._freqs(S)                                 # [S, dim//2]
        emb = jnp.concatenate([freqs, freqs], axis=-1)         # [S, dim] == [S, D//2]
        cos_e = jnp.repeat(jnp.cos(emb), 2, axis=-1)           # [S, D]
        sign = jnp.where((jnp.arange(D) % 2) == 0, -1.0, 1.0).astype(jnp.float32)
        sin_e = jnp.repeat(jnp.sin(emb), 2, axis=-1) * sign    # [S, D], sign folded in
        rows = (S * D) // L
        cos2d = cos_e.reshape(rows, L)
        sin2d = sin_e.reshape(rows, L)
        if tile > 1:
            cos2d = jnp.tile(cos2d, (tile, 1))
            sin2d = jnp.tile(sin2d, (tile, 1))
        cos2d = cos2d.astype(table_dtype)
        sin2d = sin2d.astype(table_dtype)
        if len(self._table_cache) >= self._table_cache_max:
            self._table_cache.pop(next(iter(self._table_cache)))
        self._table_cache[key] = (cos2d, sin2d)
        return cos2d, sin2d

    # ------------------------------- forward --------------------------------

    def __call__(self, q, k, seq_len=None):
        assert q.ndim == 4 and k.ndim == 4, "expected BHSD tensors"
        assert q.shape == k.shape, "q and k must share a shape"
        B, H, S, D = q.shape
        if H == self.dim:                                # mirrors reference early-exit
            return q, k
        if seq_len is None:
            seq_len = S
        assert seq_len == S, "reference BHSD broadcast requires seq_len == q.shape[2]"
        assert D % 2 == 0, "head_dim must be even for rotary embeddings"
        assert self.dim == D // 2, "reference broadcast requires dim == head_dim // 2"
        assert H == 1, "reference broadcast requires num_heads == 1 in BHSD"
        BH = B * H

        act_dtype = q.dtype
        table_dtype = act_dtype if jnp.issubdtype(act_dtype, jnp.floating) else jnp.float32

        # Lane-dense presentation: fold the (seq, head_dim) plane into 128-wide rows
        # so stores are full-lane vst.  Pairs never straddle a row (D is even).
        if (S * D) % 128 == 0:
            L = 128
        else:
            # TODO(synk): rare fallback (e.g. odd S with D not a multiple of 128)
            # keeps the full head_dim as the lane axis; stores may be masked.
            L = D
        SF = (S * D) // L                                # folded rows per (b, h) slab

        itemsize = jnp.dtype(act_dtype).itemsize
        sub_mult = max(8, 32 // itemsize)                # 8 f32 / 16 bf16 / 32 int8
        target_rows = max(sub_mult, self.block_target_bytes // (L * itemsize))

        cparams2 = pltpu.CompilerParams(
            dimension_semantics=("parallel", "parallel"),
            vmem_limit_bytes=self.vmem_limit_bytes)
        cparams1 = pltpu.CompilerParams(
            dimension_semantics=("parallel",),
            vmem_limit_bytes=self.vmem_limit_bytes)

        # ---- pick the tiling strategy ----
        use_row_grouped = (SF < target_rows) and (BH >= 2)
        g = None
        if use_row_grouped:
            g0 = 8 // math.gcd(SF, 8)                    # smallest group with 8-aligned rows
            g_raw = max(1, target_rows // SF)
            if g_raw >= g0:
                g = min(BH, (g_raw // g0) * g0)          # g == BH (full extent) is also legal
            elif BH * SF <= target_rows:
                g = BH                                   # whole problem fits one block
            else:
                use_row_grouped = False                  # fall back to sequence tiling

        if not use_row_grouped:
            # ------------- sequence-tiled path -------------
            if SF <= sub_mult:
                tsf = SF                                 # full extent (always legal)
            else:
                tsf = max(sub_mult, min((target_rows // sub_mult) * sub_mult,
                                        (SF // sub_mult) * sub_mult))
            n_sf = pl.cdiv(SF, tsf)
            if n_sf * BH < 2 and SF >= 2 * sub_mult:     # keep both v7x TensorCores busy
                tsf = _round_up(pl.cdiv(SF, 2), sub_mult)
                n_sf = pl.cdiv(SF, tsf)
            cos2d, sin2d = self._tables(S, D, L, 1, table_dtype)     # [SF, L]
            q3 = q.reshape(BH, SF, L)
            k3 = k.reshape(BH, SF, L)
            qk_spec = pl.BlockSpec((1, tsf, L), lambda i, j: (j, i, 0))
            tab_spec = pl.BlockSpec((tsf, L), lambda i, j: (i, 0))    # constant in j -> resident
            oq, ok = pl.pallas_call(
                _rope_kernel,
                out_shape=(jax.ShapeDtypeStruct((BH, SF, L), q.dtype),
                           jax.ShapeDtypeStruct((BH, SF, L), k.dtype)),
                grid=(n_sf, BH),
                in_specs=[qk_spec, qk_spec, tab_spec, tab_spec],
                out_specs=(qk_spec, qk_spec),
                compiler_params=cparams2,
            )(q3, k3, cos2d, sin2d)
        else:
            # ------------- row-grouped path -------------
            g0 = 8 // math.gcd(SF, 8)
            if pl.cdiv(BH, g) < 2:                       # expose >= 2 grid steps when legal
                g2 = _round_up(pl.cdiv(BH, 2), g0)
                if g2 < BH:
                    g = g2
            rb = g * SF
            cos2d, sin2d = self._tables(S, D, L, g, table_dtype)      # [g*SF, L]
            qf = q.reshape(BH * SF, L)
            kf = k.reshape(BH * SF, L)
            qk_spec = pl.BlockSpec((rb, L), lambda i: (i, 0))
            tab_spec = pl.BlockSpec((rb, L), lambda i: (0, 0))        # fetched once, resident
            oq, ok = pl.pallas_call(
                _rope_kernel,
                out_shape=(jax.ShapeDtypeStruct((BH * SF, L), q.dtype),
                           jax.ShapeDtypeStruct((BH * SF, L), k.dtype)),
                grid=(pl.cdiv(BH, g),),
                in_specs=[qk_spec, qk_spec, tab_spec, tab_spec],
                out_specs=(qk_spec, qk_spec),
                compiler_params=cparams1,
            )(qf, kf, cos2d, sin2d)

        return oq.reshape(B, H, S, D), ok.reshape(B, H, S, D)


if __name__ == "__main__":
    keys = jax.random.split(jax.random.PRNGKey(0), 6)

    def ref_rope(q, k, rope):
        # pure-JAX mirror of the torch BHSD path (dim == head_dim // 2, H == 1)
        S = q.shape[2]
        t = jnp.arange(S, dtype=jnp.float32)
        freqs = t[:, None] * rope.inv_freq[None, :]
        emb = jnp.concatenate([freqs, freqs], axis=-1)        # [S, D//2]
        cos_b = jnp.cos(emb)[None, None]
        sin_b = jnp.sin(emb)[None, None]

        def rot(x):
            x = x.astype(jnp.float32)
            xe, xo = x[..., 0::2], x[..., 1::2]
            re = xe * cos_b - xo * sin_b
            ro = xo * cos_b + xe * sin_b
            return jnp.stack([re, ro], axis=-1).reshape(x.shape)

        return rot(q), rot(k)

    # Case 1: tiny shapes -> row-grouped path (whole problem in a single block).
    B, H, S, D = 2, 1, 8, 16
    q = jax.random.normal(keys[0], (B, H, S, D), dtype=jnp.float32)
    k = jax.random.normal(keys[1], (B, H, S, D), dtype=jnp.float32)
    rope = RotaryEmbeddingPallas(dim=D // 2, base=10000)
    q_rot, k_rot = rope(q, k, seq_len=S)
    jax.block_until_ready((q_rot, k_rot))
    q_ref, k_ref = ref_rope(q, k, rope)
    assert jnp.allclose(q_rot, q_ref, atol=1e-5, rtol=1e-5)
    assert jnp.allclose(k_rot, k_ref, atol=1e-5, rtol=1e-5)

    # Case 2: a small block budget forces the sequence-tiled (table-resident)
    # path at modest shapes (grid = (4 seq tiles, 1)).
    B2, H2, S2, D2 = 1, 1, 256, 128
    q2 = jax.random.normal(keys[2], (B2, H2, S2, D2), dtype=jnp.float32)
    k2 = jax.random.normal(keys[3], (B2, H2, S2, D2), dtype=jnp.float32)
    rope2 = RotaryEmbeddingPallas(dim=D2 // 2, base=10000, block_target_bytes=32 * 1024)
    q2_rot, k2_rot = rope2(q2, k2, seq_len=S2)
    jax.block_until_ready((q2_rot, k2_rot))
    q2_ref, k2_ref = ref_rope(q2, k2, rope2)
    assert jnp.allclose(q2_rot, q2_ref, atol=1e-5, rtol=1e-5)
    assert jnp.allclose(k2_rot, k2_ref, atol=1e-5, rtol=1e-5)

    # Case 3: bf16 activations + bf16 tables + a ragged cdiv grid
    # (72 rows tiled by 64-row blocks, grid = (2, 2)).
    B3, H3, S3, D3 = 2, 1, 72, 128
    q3 = jax.random.normal(keys[4], (B3, H3, S3, D3), dtype=jnp.float32).astype(jnp.bfloat16)
    k3 = jax.random.normal(keys[5], (B3, H3, S3, D3), dtype=jnp.float32).astype(jnp.bfloat16)
    rope3 = RotaryEmbeddingPallas(dim=D3 // 2, base=10000, block_target_bytes=16 * 1024)
    q3_rot, k3_rot = rope3(q3, k3, seq_len=S3)
    jax.block_until_ready((q3_rot, k3_rot))
    q3_ref, k3_ref = ref_rope(q3, k3, rope3)
    assert jnp.allclose(q3_rot.astype(jnp.float32), q3_ref, atol=5e-2, rtol=5e-2)
    assert jnp.allclose(k3_rot.astype(jnp.float32), k3_ref, atol=5e-2, rtol=5e-2)

    print("KERNEL_OK")
</pallas_src>

<mosaic_0001>
module attributes {stable_mosaic.version = 11 : i64} {
  func.func @_rope_kernel(%arg0: i32, %arg1: memref<2x128xf32, #tpu.memory_space<vmem>>, %arg2: memref<2x128xf32, #tpu.memory_space<vmem>>, %arg3: memref<2x128xf32, #tpu.memory_space<vmem>>, %arg4: memref<2x128xf32, #tpu.memory_space<vmem>>, %arg5: memref<2x128xf32, #tpu.memory_space<vmem>>, %arg6: memref<2x128xf32, #tpu.memory_space<vmem>>) attributes {dimension_semantics = [#tpu.dimension_semantics<parallel>], iteration_bounds = array<i64: 1>, scalar_prefetch = 0 : i64, scratch_operands = 0 : i64, tpu.core_type = #tpu.core_type<tc>, window_params = [{transform_indices = @transform_0, window_bounds = array<i64: 2, 128>}, {transform_indices = @transform_1, window_bounds = array<i64: 2, 128>}, {pipeline_mode = #tpu.pipeline_mode<synchronous>, transform_indices = @transform_2, window_bounds = array<i64: 2, 128>}, {pipeline_mode = #tpu.pipeline_mode<synchronous>, transform_indices = @transform_3, window_bounds = array<i64: 2, 128>}, {transform_indices = @transform_4, window_bounds = array<i64: 2, 128>}, {transform_indices = @transform_5, window_bounds = array<i64: 2, 128>}]} {
    %c0 = arith.constant 0 : index
    %c0_0 = arith.constant 0 : index
    %0 = vector.load %arg3[%c0, %c0_0] : memref<2x128xf32, #tpu.memory_space<vmem>>, vector<2x128xf32>
    %c0_1 = arith.constant 0 : index
    %c0_2 = arith.constant 0 : index
    %1 = vector.load %arg4[%c0_1, %c0_2] : memref<2x128xf32, #tpu.memory_space<vmem>>, vector<2x128xf32>
    %2 = tpu.iota {dimensions = array<i32: 1>} : vector<2x128xi32>
    %c1_i32 = arith.constant 1 : i32
    %3 = vector.broadcast %c1_i32 : i32 to vector<2x128xi32>
    %4 = arith.andi %2, %3 : vector<2x128xi32>
    %c0_i32 = arith.constant 0 : i32
    %5 = vector.broadcast %c0_i32 : i32 to vector<2x128xi32>
    %6 = arith.cmpi eq, %4, %5 : vector<2x128xi32>
    %c0_3 = arith.constant 0 : index
    %c0_4 = arith.constant 0 : index
    %7 = vector.load %arg1[%c0_3, %c0_4] : memref<2x128xf32, #tpu.memory_space<vmem>>, vector<2x128xf32>
    %c127_i32 = arith.constant 127 : i32
    %8 = tpu.dynamic_rotate %7 by %c127_i32 dim 1 : vector<2x128xf32>, i32 -> vector<2x128xf32>
    %c1_i32_5 = arith.constant 1 : i32
    %9 = tpu.dynamic_rotate %7 by %c1_i32_5 dim 1 : vector<2x128xf32>, i32 -> vector<2x128xf32>
    %10 = arith.select %6, %8, %9 : vector<2x128xi1>, vector<2x128xf32>
    %11 = arith.mulf %7, %0 : vector<2x128xf32>
    %12 = arith.mulf %10, %1 : vector<2x128xf32>
    %13 = arith.addf %11, %12 : vector<2x128xf32>
    %c0_6 = arith.constant 0 : index
    %c0_7 = arith.constant 0 : index
    %14 = vector.load %arg5[%c0_6, %c0_7] : memref<2x128xf32, #tpu.memory_space<vmem>>, vector<2x128xf32>
    tpu.vector_store %arg5[%c0_6, %c0_7], %13 {strides = array<i32>} : memref<2x128xf32, #tpu.memory_space<vmem>>, vector<2x128xf32>,
    %c0_8 = arith.constant 0 : index
    %c0_9 = arith.constant 0 : index
    %15 = vector.load %arg2[%c0_8, %c0_9] : memref<2x128xf32, #tpu.memory_space<vmem>>, vector<2x128xf32>
    %c127_i32_10 = arith.constant 127 : i32
    %16 = tpu.dynamic_rotate %15 by %c127_i32_10 dim 1 : vector<2x128xf32>, i32 -> vector<2x128xf32>
    %c1_i32_11 = arith.constant 1 : i32
    %17 = tpu.dynamic_rotate %15 by %c1_i32_11 dim 1 : vector<2x128xf32>, i32 -> vector<2x128xf32>
    %18 = arith.select %6, %16, %17 : vector<2x128xi1>, vector<2x128xf32>
    %19 = arith.mulf %15, %0 : vector<2x128xf32>
    %20 = arith.mulf %18, %1 : vector<2x128xf32>
    %21 = arith.addf %19, %20 : vector<2x128xf32>
    %c0_12 = arith.constant 0 : index
    %c0_13 = arith.constant 0 : index
    %22 = vector.load %arg6[%c0_12, %c0_13] : memref<2x128xf32, #tpu.memory_space<vmem>>, vector<2x128xf32>
    tpu.vector_store %arg6[%c0_12, %c0_13], %21 {strides = array<i32>} : memref<2x128xf32, #tpu.memory_space<vmem>>, vector<2x128xf32>,
    return
  }
  func.func @transform_0(%arg0: i32) -> (i32, i32) {
    %c0_i32 = arith.constant 0 : i32
    %c0_i32_0 = arith.constant 0 : i32
    return %arg0, %c0_i32 : i32, i32
  }
  func.func @transform_1(%arg0: i32) -> (i32, i32) {
    %c0_i32 = arith.constant 0 : i32
    %c0_i32_0 = arith.constant 0 : i32
    return %arg0, %c0_i32 : i32, i32
  }
  func.func @transform_2(%arg0: i32) -> (i32, i32) {
    %c0_i32 = arith.constant 0 : i32
    %c0_i32_0 = arith.constant 0 : i32
    %c0_i32_1 = arith.constant 0 : i32
    return %c0_i32, %c0_i32_0 : i32, i32
  }
  func.func @transform_3(%arg0: i32) -> (i32, i32) {
    %c0_i32 = arith.constant 0 : i32
    %c0_i32_0 = arith.constant 0 : i32
    %c0_i32_1 = arith.constant 0 : i32
    return %c0_i32, %c0_i32_0 : i32, i32
  }
  func.func @transform_4(%arg0: i32) -> (i32, i32) {
    %c0_i32 = arith.constant 0 : i32
    %c0_i32_0 = arith.constant 0 : i32
    return %arg0, %c0_i32 : i32, i32
  }
  func.func @transform_5(%arg0: i32) -> (i32, i32) {
    %c0_i32 = arith.constant 0 : i32
    %c0_i32_0 = arith.constant 0 : i32
    return %arg0, %c0_i32 : i32, i32
  }
}

</mosaic_0001>

<bundles_post_ra>
// kernel: tpu_custom_call.1
= control target key start
LH: loop header
LB: loop body
LE: loop exit
PB: predicated region body
PF: predicated region fallthrough
CT: control target
= control target key end

     0   :  { %11 = vsyncpa [#allocation3], 0  ;;  %s312_s0 = inlined_call_operand.hbm [shape: f32[2,128], index: 0, kind: input, shape index: {}]   ;;  %s313_s1 = inlined_call_operand.hbm [shape: f32[2,128], index: 1, kind: input, shape index: {}]   ;;  %s314_s2 = inlined_call_operand.hbm [shape: f32[2,128], index: 2, kind: input, shape index: {}]   ;;  %s315_s3 = inlined_call_operand.vmem [shape: f32[2,128], index: 3, kind: input, shape index: {}]   ;;  %s316_s4 = inlined_call_operand.hbm [shape: f32[2,128], index: 4, kind: output, shape index: {0}]   ;;  %s317_s5 = inlined_call_operand.hbm [shape: f32[2,128], index: 5, kind: output, shape index: {1}]  }
   0x1   :  { %12 = vsyncpa [#allocation6], 0 }
   0x2   :  { %13 = vsyncpa [#allocation4], 0  ;;  %s31_s20 = sshll.u32 %s313_s1, 4  ;;  %s32_s20 = int_to_ptr.hbm [resolvable:$true] %s31_s20 }
   0x3   :  { %14 = vsyncpa [#allocation10], 0  ;;  %s257_s21 = smov [#allocation5]   ;;  %s20_s25 = sshll.u32 %s312_s0, 4  ;;  %s21_s25 = int_to_ptr.hbm [resolvable:$true] %s20_s25 }
   0x4   :  { %s33_s22 = sshll.u32 %s257_s21, 4  ;;  %s258_s26 = smov [#allocation2]   ;;  %s34_s22 = int_to_ptr.vmem [resolvable:$true] %s33_s22 }
   0x5   :  { %36 = dma.hbm_to_vmem [thread:$0]  %s32_s20, 32, %s34_s22, [#allocation6]  }
   0x6   :  { %s22_s27 = sshll.u32 %s258_s26, 4  ;;  %s42_s30 = sshll.u32 %s314_s2, 4  ;;  %s23_s27 = int_to_ptr.vmem [resolvable:$true] %s22_s27  ;;  %s43_s30 = int_to_ptr.hbm [resolvable:$true] %s42_s30 }
   0x7   :  { %25 = dma.hbm_to_vmem [thread:$0]  %s21_s25, 32, %s23_s27, [#allocation3]  }
   0x8   :  { %s259_s1 = smov [#allocation7]  }
   0x9   :  { %s44_s6 = sshll.u32 %s259_s1, 4  ;;  %s45_s6 = int_to_ptr.vmem [resolvable:$true] %s44_s6 }
   0xa   :  { %47 = dma.hbm_to_vmem [thread:$0]  %s43_s30, 32, %s45_s6, [#allocation6]  }
   0xb   :  { %249 = dma.done.wait [#allocation3], 32  }
   0xc   :  { %250 = vsyncadd [#allocation3], 4294967264 }
   0xd   :  { %251 = dma.done.wait [#allocation6], 64  }
   0xe   :  { %252 = vsyncadd [#allocation6], 4294967232  ;;  %v78_v0 = vld [vmem:[#allocation5] sm:$0x3]  ;;  %v68_v1 = vld [vmem:[#allocation2] sm:$0x3]  ;;  %v64_v2 = vlaneseq }
   0xf   :  { %s260_s0 = smov 127   ;;  %s261_s7 = smov 1   ;;  %v62_v7 = vld [vmem:[#allocation7] sm:$0x3]  ;;  %v63_v8 = vld [vmem:[%s315_s3] sm:$0x3] }
  0x10   :  { %79 = vrot.lane.b32.xlu1 %v78_v0, %s260_s0  ;;  %69 = vrot.lane.b32.xlu0 %v68_v1, %s260_s0  ;;  %v65_v3 = vand.u32 127, %v64_v2  ;;  %v84_v9 = vmul.f32 %v78_v0, %v62_v7  ;;  %v74_v10 = vmul.f32 %v68_v1, %v62_v7  ;;  %s262_s9 = smov [#allocation9]   ;;  %s106_s13 = sshll.u32 %s317_s5, 4  ;;  %s107_s13 = int_to_ptr.hbm [resolvable:$true] %s106_s13 }
  0x11   :  { %s104_s10 = sshll.u32 %s262_s9, 4  ;;  %s263_s14 = smov [#allocation8]   ;;  %s105_s10 = int_to_ptr.vmem [resolvable:$true] %s104_s10 }
  0x12   :  { %v66_v6 = vand.u32 1, %v65_v3  ;;  %s93_s15 = sshll.u32 %s263_s14, 4  ;;  %s95_s3 = sshll.u32 %s316_s4, 4  ;;  %s94_s15 = int_to_ptr.vmem [resolvable:$true] %s93_s15  ;;  %s96_s3 = int_to_ptr.hbm [resolvable:$true] %s95_s3 }
  0x14   :  { %vm67_vm0 = vcmp.eq.s32.totalorder %v66_v6, 0 }
  0x18   :  { %81 = vrot.lane.b32.xlu1 %v78_v0, %s261_s7  ;;  %71 = vrot.lane.b32.xlu0 %v68_v1, %s261_s7 }
  0x82   :  { %v80_v4 = vpop.permute.xlu1 %79  ;;  %v70_v5 = vpop.permute.xlu0 %69 }
  0x8a   :  { %v82_v11 = vpop.permute.xlu1 %81  ;;  %v72_v12 = vpop.permute.xlu0 %71 }
  0x8b   :  { %v83_v13 = vsel %vm67_vm0, %v80_v4, %v82_v11  ;;  %v73_v14 = vsel %vm67_vm0, %v70_v5, %v72_v12 }
  0x8c   :  { %v85_v15 = vmul.f32 %v83_v13, %v63_v8  ;;  %v75_v16 = vmul.f32 %v73_v14, %v63_v8 }
  0x8e   :  { %v86_v17 = vadd.f32 %v85_v15, %v84_v9  ;;  %v76_v18 = vadd.f32 %v75_v16, %v74_v10 }
  0x90   :  { %87 = vst [vmem:[#allocation9] sm:$0x3] %v86_v17 }
  0x91   :  { %77 = vst [vmem:[#allocation8] sm:$0x3] %v76_v18  ;;  %109 = dma.vmem_to_hbm [thread:$0]  %s105_s10, 32, %s107_s13, [#allocation10]  }
  0x92   :  { %98 = dma.vmem_to_hbm [thread:$0]  %s94_s15, 32, %s96_s3, [#allocation4]  }
  0x93   :  { %253 = dma.done.wait [#allocation4], 32  }
  0x94   :  { %254 = vsyncadd [#allocation4], 4294967264 }
  0x95   :  { %255 = dma.done.wait [#allocation10], 32  }
  0x96   :  { %256 = vsyncadd [#allocation10], 4294967264 }
  0x97   :  { %118 = vsyncpa [#allocation3], 1 }
  0x98   :  { %119 = vsyncpa [#allocation6], 1 }
  0x99   :  { %120 = vsyncpa [#allocation4], 1 }
  0x9a   :  { %121 = vsyncpa [#allocation10], 1 }

</bundles_post_ra>
